<compile_context>
chip_gen: v7x
topology: tpu7x:2x2x1
jax: 0.10.0
libtpu: 0.0.40
codegen_flags: <defaults>
</compile_context>

<pallas_src>
import math

import jax
import jax.numpy as jnp
from jax.experimental import pallas as pl
from jax.experimental.pallas import tpu as pltpu


def _layer_scale_kernel(x_ref, gamma_ref, o_ref):
    # x_ref: (tr, tc) tile; gamma_ref: (1, tc) tile (broadcast over rows).
    prod = x_ref[...].astype(jnp.float32) * gamma_ref[...].astype(jnp.float32)
    o_ref[...] = prod.astype(o_ref.dtype)


def _round_up(v: int, m: int) -> int:
    return -(-v // m) * m


def _vreg_tiles(r: int, w: int) -> int:
    """Number of (8, 128) vreg tiles touched by an (r, w) layout."""
    return (_round_up(max(r, 1), 8) // 8) * (_round_up(max(w, 1), 128) // 128)


def _fold_factor(rows: int, dim: int, max_width: int = 8192) -> int:
    """Pick k dividing `rows` so folding k consecutive rows into the lane axis
    (width k*dim) minimizes the number of (8,128) tiles touched, i.e. maximizes
    lane/sublane store density.  Returns 1 when no fold helps."""
    if rows <= 1 or dim % 128 == 0:
        return 1
    # Enumerate divisors of rows (trace-time Python; shapes are static).
    divs = set()
    i = 1
    while i * i <= rows:
        if rows % i == 0:
            divs.add(i)
            divs.add(rows // i)
        i += 1
    best_k = 1
    best_cost = _vreg_tiles(rows, dim)
    for k in sorted(divs):
        if k == 1 or k * dim > max_width:
            continue
        cost = _vreg_tiles(rows // k, k * dim)
        if cost < best_cost:  # strict '<': ties keep the smaller k (more rows -> more parallel blocks)
            best_cost, best_k = cost, k
    # TODO(synk): row counts with no useful divisor (e.g. 111 rows, even-only
    # fold base) could be covered by a tail pallas_call on the remainder rows.
    return best_k


def layer_scale(x: jax.Array, gamma: jax.Array, *,
                inplace: bool = False,
                target_tile_bytes: int = 8 * 1024 * 1024) -> jax.Array:
    """Pallas TPU implementation of LayerScale.forward: x * gamma (broadcast on last dim)."""
    assert x.shape[-1] == gamma.shape[-1], "last dim of x must equal gamma dim"
    orig_shape = x.shape
    dim = int(x.shape[-1])
    rows = 1
    for s in x.shape[:-1]:
        rows *= int(s)
    rows = max(rows, 1)

    # Torch-style type promotion (bf16 x * f32 gamma -> f32 out).
    out_dtype = jnp.promote_types(x.dtype, gamma.dtype)
    x_item = jnp.dtype(x.dtype).itemsize
    out_item = jnp.dtype(out_dtype).itemsize
    gamma_item = jnp.dtype(gamma.dtype).itemsize

    # Per-core VMEM capacity (v7x: 64 MiB, v5e/v6e: 128 MiB).
    try:
        vmem_cap = int(pltpu.get_tpu_info().vmem_capacity_bytes)
    except Exception:
        vmem_cap = 64 * 1024 * 1024  # conservative fallback (v7x per-core)
    target_tile_bytes = max(min(target_tile_bytes, vmem_cap // 8), 1 << 20)

    # --- Lane-densify: fold rows into the lane axis when dim is lane-sparse. ---
    k = _fold_factor(rows, dim)
    W = k * dim
    rows_f = rows // k
    x2d = x.reshape(rows_f, W)
    gamma_row = gamma.reshape(1, dim)
    if k > 1:
        gamma_row = jnp.tile(gamma_row, (1, k))  # (1, k*dim), matches row folding

    # --- Column tile: full width unless dim is enormous. ---
    if W <= 2048 or W * 8 * x_item <= target_tile_bytes:
        tc = W
    else:
        tc = 2048  # multiple of 128; partial last column block is masked

    # --- Row tile: size by bytes, round to a packing-friendly sublane multiple. ---
    sub = {1: 32, 2: 16}.get(x_item, 8)  # int8/fp8 -> 32, bf16 -> 16, f32 -> 8
    tr = target_tile_bytes // max(tc * x_item, 1)
    tr = max(sub, (tr // sub) * sub)
    if tr >= rows_f:
        tr = rows_f
    # Megacore (v7x has 2 TensorCores): guarantee >= 2 row blocks when possible
    # so both cores get a share of the "parallel" row axis.
    if pl.cdiv(rows_f, tr) == 1 and rows_f > sub:
        tr = _round_up(-(-rows_f // 2), sub)

    n_row_blocks = pl.cdiv(rows_f, tr)
    n_col_blocks = pl.cdiv(W, tc)

    # --- Grid & specs.  gamma stays resident (constant block index) in the
    # common path; in the huge-dim fallback the column axis is the OUTER grid
    # axis so gamma is only re-fetched when the column block changes. ---
    if n_col_blocks == 1:
        grid = (n_row_blocks,)
        x_spec = pl.BlockSpec((tr, W), lambda i: (i, 0))
        g_spec = pl.BlockSpec((1, W), lambda i: (0, 0))   # constant -> fetched once
        o_spec = pl.BlockSpec((tr, W), lambda i: (i, 0))
        dims = ("parallel",)
    else:
        grid = (n_col_blocks, n_row_blocks)
        x_spec = pl.BlockSpec((tr, tc), lambda j, i: (i, j))
        g_spec = pl.BlockSpec((1, tc), lambda j, i: (0, j))
        o_spec = pl.BlockSpec((tr, tc), lambda j, i: (i, j))
        dims = ("parallel", "parallel")

    # --- Scoped-VMEM limit from the actual double-buffered footprint. ---
    # TODO(synk): a pipeline_mode=pl.Buffered(3) on the x input would hide HBM
    # latency jitter on v6e at the cost of one extra tile of VMEM.
    x_tile_b = tr * tc * x_item
    o_tile_b = tr * tc * out_item
    g_tile_b = 8 * _round_up(tc, 128) * gamma_item
    footprint = 2 * x_tile_b + 2 * o_tile_b + 2 * g_tile_b
    vmem_limit = int(min(vmem_cap, max(footprint + 8 * 1024 * 1024, 16 * 1024 * 1024)))

    cost = pl.CostEstimate(
        flops=rows * dim,
        transcendentals=0,
        bytes_accessed=rows * dim * (x_item + out_item) + dim * gamma_item,
    )

    # inplace=True (torch's x.mul_): reuse x's HBM buffer for the output when the
    # caller donates x.  Only legal when the output dtype matches x's dtype.
    io_aliases = {0: 0} if (inplace and out_dtype == x.dtype) else {}

    out = pl.pallas_call(
        _layer_scale_kernel,
        out_shape=jax.ShapeDtypeStruct((rows_f, W), out_dtype),
        grid_spec=pltpu.PrefetchScalarGridSpec(
            num_scalar_prefetch=0,
            grid=grid,
            in_specs=[x_spec, g_spec],
            out_specs=o_spec,
        ),
        compiler_params=pltpu.CompilerParams(
            dimension_semantics=dims,
            vmem_limit_bytes=vmem_limit,
        ),
        cost_estimate=cost,
        input_output_aliases=io_aliases,
    )(x2d, gamma_row)

    return out.reshape(orig_shape)


if __name__ == "__main__":
    key = jax.random.PRNGKey(0)
    init_values = 1e-5

    # Matches LayerScale(dim=32): nn.Parameter(init_values * torch.ones(dim)).
    batch, seq, dim = 2, 8, 32
    gamma = init_values * jnp.ones((dim,), dtype=jnp.float32)
    x = jax.random.normal(key, (batch, seq, dim), dtype=jnp.float32)
    y = jax.block_until_ready(layer_scale(x, gamma))
    assert y.shape == x.shape and y.dtype == x.dtype
    assert jnp.allclose(y, x * gamma, atol=1e-6, rtol=1e-6), "mismatch vs reference"

    # Odd row count / non-128 dim: exercises the generalized lane-densify fold,
    # the >=2-row-block split, and the cdiv-masked partial last block.
    x2 = jax.random.normal(jax.random.PRNGKey(1), (3, 37, 192), dtype=jnp.float32)
    g2 = init_values * jnp.ones((192,), dtype=jnp.float32)
    y2 = jax.block_until_ready(layer_scale(x2, g2))
    assert jnp.allclose(y2, x2 * g2, atol=1e-6, rtol=1e-6), "mismatch vs reference (case 2)"

    # Mixed precision: bf16 activations with an f32 gamma -> f32 output
    # (matches torch type promotion for the non-autocast case).
    x3 = jax.random.normal(jax.random.PRNGKey(2), (4, 16, 1024), dtype=jnp.bfloat16)
    g3 = init_values * jnp.ones((1024,), dtype=jnp.float32)
    y3 = jax.block_until_ready(layer_scale(x3, g3))
    assert y3.dtype == jnp.float32
    assert jnp.allclose(y3, x3.astype(jnp.float32) * g3, atol=1e-6, rtol=1e-6), \
        "mismatch vs reference (case 3)"

    # inplace=True (torch's x.mul_): output aliases x's buffer when the caller
    # donates x; without donation XLA inserts a protective copy (still correct).
    x4 = jax.random.normal(jax.random.PRNGKey(3), (batch, seq, dim), dtype=jnp.float32)
    ref4 = x4 * gamma
    y4 = jax.block_until_ready(layer_scale(x4, gamma, inplace=True))
    assert jnp.allclose(y4, ref4, atol=1e-6, rtol=1e-6), "mismatch vs reference (case 4)"

    print("KERNEL_OK")
</pallas_src>

<mosaic_0001>
module attributes {stable_mosaic.version = 11 : i64} {
  func.func @_layer_scale_kernel(%arg0: i32, %arg1: memref<8x64xf32, #tpu.memory_space<vmem>>, %arg2: memref<1x64xf32, #tpu.memory_space<vmem>>, %arg3: memref<8x64xf32, #tpu.memory_space<vmem>>) attributes {dimension_semantics = [#tpu.dimension_semantics<parallel>], iteration_bounds = array<i64: 1>, scalar_prefetch = 0 : i64, scratch_operands = 0 : i64, tpu.core_type = #tpu.core_type<tc>, window_params = [{transform_indices = @transform_0, window_bounds = array<i64: 8, 64>}, {pipeline_mode = #tpu.pipeline_mode<synchronous>, transform_indices = @transform_1, window_bounds = array<i64: 1, 64>}, {transform_indices = @transform_2, window_bounds = array<i64: 8, 64>}]} {
    %c0 = arith.constant 0 : index
    %c0_0 = arith.constant 0 : index
    %0 = vector.load %arg1[%c0, %c0_0] : memref<8x64xf32, #tpu.memory_space<vmem>>, vector<8x64xf32>
    %c0_1 = arith.constant 0 : index
    %c0_2 = arith.constant 0 : index
    %1 = vector.load %arg2[%c0_1, %c0_2] : memref<1x64xf32, #tpu.memory_space<vmem>>, vector<1x64xf32>
    %2 = vector.broadcast %1 : vector<1x64xf32> to vector<8x64xf32>
    %3 = arith.mulf %0, %2 : vector<8x64xf32>
    %c0_3 = arith.constant 0 : index
    %c0_4 = arith.constant 0 : index
    %4 = vector.load %arg3[%c0_3, %c0_4] : memref<8x64xf32, #tpu.memory_space<vmem>>, vector<8x64xf32>
    tpu.vector_store %arg3[%c0_3, %c0_4], %3 {strides = array<i32>} : memref<8x64xf32, #tpu.memory_space<vmem>>, vector<8x64xf32>,
    return
  }
  func.func @transform_0(%arg0: i32) -> (i32, i32) {
    %c0_i32 = arith.constant 0 : i32
    %c0_i32_0 = arith.constant 0 : i32
    return %arg0, %c0_i32 : i32, i32
  }
  func.func @transform_1(%arg0: i32) -> (i32, i32) {
    %c0_i32 = arith.constant 0 : i32
    %c0_i32_0 = arith.constant 0 : i32
    %c0_i32_1 = arith.constant 0 : i32
    return %c0_i32, %c0_i32_0 : i32, i32
  }
  func.func @transform_2(%arg0: i32) -> (i32, i32) {
    %c0_i32 = arith.constant 0 : i32
    %c0_i32_0 = arith.constant 0 : i32
    return %arg0, %c0_i32 : i32, i32
  }
}

</mosaic_0001>

<bundles_post_ra>
// kernel: tpu_custom_call.1
= control target key start
LH: loop header
LB: loop body
LE: loop exit
PB: predicated region body
PF: predicated region fallthrough
CT: control target
= control target key end

     0   :  { %7 = vsyncpa [#allocation3], 0  ;;  %s145_s0 = inlined_call_operand.hbm [shape: f32[8,64], index: 0, kind: input, shape index: {}]   ;;  %s146_s1 = inlined_call_operand.vmem [shape: f32[1,64], index: 1, kind: input, shape index: {}]   ;;  %s147_s2 = inlined_call_operand.hbm [shape: f32[8,64], index: 2, kind: output, shape index: {}]  }
   0x1   :  { %8 = vsyncpa [#allocation4], 0  ;;  %s101_s9 = smov [#allocation2]   ;;  %s53_s13 = scalar_lea.hbm %s145_s0, 128 }
   0x2   :  { %s15_s10 = sshll.u32 %s101_s9, 4  ;;  %p54_p0 = scmp.ne.s32.totalorder %s145_s0, %s53_s13  ;;  %s16_s10 = int_to_ptr.vmem [resolvable:$true] %s15_s10 }
   0x3   :  { %p57_p1 = scmp.lt.u32.totalorder %s53_s13, %s145_s0 }
   0x5   :  { %p59_p2 = pnand %p57_p1, %p54_p0 }
   0x7   :  { %62 = shalt.err (!%p59_p2)
}
   0x8   :  { %s63_s18 = scalar_lea.vmem %s16_s10, 128  ;;  %p68_p4 = scmp.lt.s32.totalorder %s16_s10, %s16_s10 }
   0x9   :  { %p64_p3 = scmp.ne.s32.totalorder %s16_s10, %s63_s18  ;;  %p69_p5 = scmp.lt.s32.totalorder %s63_s18, %s63_s18 }
   0xb   :  { %p70_p6 = por %p69_p5, %p68_p4 }
   0xd   :  { %p71_p7 = pnand %p70_p6, %p64_p3 }
   0xf   :  { %74 = shalt.err (!%p71_p7)
}
  0x10   :  { %18 = dma.hbm_to_vmem [thread:$0]  %s145_s0, 128, %s16_s10, [#allocation3]  }
  0x11   :  { %97 = dma.done.wait [#allocation3], 128  }
  0x12   :  { %98 = vsyncadd [#allocation3], 4294967168  ;;  %s102_s21 = smov [#allocation5]   ;;  %v24_v0 = vld [vmem:[#allocation2] sm:$0xff]  ;;  %vm33_vm0 = vcmask 523264  }
  0x13   :  { %s41_s22 = sshll.u32 %s102_s21, 4  ;;  %v50_v1 = vld [vmem:[%s146_s1] ss:$0 sm:$0xff]  ;;  %s42_s22 = int_to_ptr.vmem [resolvable:$true] %s41_s22 }
  0x14   :  { %v32_v2 = vmul.f32 %v50_v1, %v24_v0  ;;  %s75_s25 = scalar_lea.vmem %s42_s22, 128  ;;  %p80_p9 = scmp.lt.s32.totalorder %s42_s22, %s42_s22 }
  0x15   :  { %p76_p8 = scmp.ne.s32.totalorder %s42_s22, %s75_s25  ;;  %p81_p10 = scmp.lt.s32.totalorder %s75_s25, %s75_s25 }
  0x16   :  { %34 = vst.msk [vmem:[#allocation5] sm:$0xff] %vm33_vm0, %v32_v2 }
  0x17   :  { %p82_p11 = por %p81_p10, %p80_p9 }
  0x19   :  { %p83_p12 = pnand %p82_p11, %p76_p8 }
  0x1b   :  { %86 = shalt.err (!%p83_p12)
}
  0x1c   :  { %s87_s27 = scalar_lea.hbm %s147_s2, 128 }
  0x1d   :  { %p88_p13 = scmp.ne.s32.totalorder %s147_s2, %s87_s27  ;;  %p91_p0 = scmp.lt.u32.totalorder %s87_s27, %s147_s2 }
  0x1f   :  { %p93_p1 = pnand %p91_p0, %p88_p13 }
  0x21   :  { %96 = shalt.err (!%p93_p1)
}
  0x22   :  { %44 = dma.vmem_to_hbm [thread:$0]  %s42_s22, 128, %s147_s2, [#allocation4]  }
  0x23   :  { %99 = dma.done.wait [#allocation4], 128  }
  0x24   :  { %100 = vsyncadd [#allocation4], 4294967168 }
  0x25   :  { %48 = vsyncpa [#allocation3], 1 }
  0x26   :  { %49 = vsyncpa [#allocation4], 1 }

</bundles_post_ra>
